<compile_context>
chip_gen: v7x
topology: tpu7x:2x2x1
jax: 0.10.0
libtpu: 0.0.40
codegen_flags: <defaults>
</compile_context>

<pallas_src>
import jax
import jax.numpy as jnp
import numpy as np
from jax import lax
from jax.experimental import pallas as pl
from jax.experimental.pallas import tpu as pltpu


def _posemb_concat_kernel(x_ref, inv_freq_ref, o_ref):
    # x_ref:        (C, TILE_T)        input slab for one batch element / seq tile
    # inv_freq_ref: (H, 1)             per-row frequencies, H = dim // 2
    # o_ref:        (C + 2H, TILE_T)   [x rows, sin rows, cos rows]
    tile_t = x_ref.shape[-1]
    j = pl.program_id(1)                                    # seq-tile index
    # Global positions for this tile, along the lane axis.
    pos = (j * tile_t
           + lax.broadcasted_iota(jnp.int32, (1, tile_t), 1)).astype(jnp.float32)
    phase = inv_freq_ref[...] * pos                         # (H, TILE_T), f32, on VPU
    o_ref[...] = jnp.concatenate(
        [x_ref[...],
         jnp.sin(phase).astype(o_ref.dtype),                # EUP
         jnp.cos(phase).astype(o_ref.dtype)],
        axis=0)


def fixed_positional_embedding(x, dim, *, seq_tile=512):
    """Forward of FixedPositionalEmbedding.

    x:   (B, C, T)
    dim: embedding dim (even); inv_freq = 1 / 10000**(arange(0, dim, 2)/dim)
    returns (B, C + dim, T)
    """
    B, C, T = x.shape
    assert dim % 2 == 0, "dim must be even"
    H = dim // 2

    inv_freq = 1.0 / (10000.0 ** (jnp.arange(0, dim, 2, dtype=jnp.float32) / dim))
    inv_freq_col = inv_freq.reshape(H, 1)

    # Lane-axis tile: full T when small (legal: equals the array dim), else a
    # multiple of 128 so blocks stay (8,128)-legal and VMEM bounded (v7x-safe).
    tile_t = T if T <= seq_tile else seq_tile
    grid = (B, pl.cdiv(T, tile_t))

    itemsize = jnp.dtype(x.dtype).itemsize
    cost = pl.CostEstimate(
        flops=2 * B * H * T,
        transcendentals=2 * B * H * T,
        bytes_accessed=(B * C * T + B * (C + dim) * T) * itemsize + H * 4,
    )

    return pl.pallas_call(
        _posemb_concat_kernel,
        out_shape=jax.ShapeDtypeStruct((B, C + dim, T), x.dtype),
        grid=grid,
        in_specs=[
            pl.BlockSpec((None, C, tile_t), lambda b, j: (b, 0, j)),
            pl.BlockSpec((H, 1), lambda b, j: (0, 0)),
        ],
        out_specs=pl.BlockSpec((None, C + dim, tile_t), lambda b, j: (b, 0, j)),
        compiler_params=pltpu.CompilerParams(
            dimension_semantics=("parallel", "parallel")),
        cost_estimate=cost,
    )(x, inv_freq_col)


def _reference(x, dim):
    """Pure-JAX reference mirroring the PyTorch semantics."""
    B, C, T = x.shape
    inv_freq = 1.0 / (10000.0 ** (jnp.arange(0, dim, 2, dtype=jnp.float32) / dim))
    t = jnp.arange(T, dtype=jnp.float32)
    sinusoid = jnp.einsum('i,j->ij', t, inv_freq)                        # (T, H)
    emb = jnp.concatenate([jnp.sin(sinusoid), jnp.cos(sinusoid)], -1)    # (T, dim)
    emb_bht = jnp.broadcast_to(emb.T[None], (B, dim, T)).astype(x.dtype)
    return jnp.concatenate([x, emb_bht], axis=1)


if __name__ == "__main__":
    key = jax.random.PRNGKey(0)
    k1, k2 = jax.random.split(key)

    # Small shapes implied by the forward: batch=2, channels=4, seq=16, dim=8.
    B, C, T, dim = 2, 4, 16, 8
    x = jax.random.normal(k1, (B, C, T), dtype=jnp.float32)
    out = jax.block_until_ready(fixed_positional_embedding(x, dim))
    ref = _reference(x, dim)
    assert out.shape == (B, C + dim, T)
    np.testing.assert_allclose(np.asarray(out), np.asarray(ref),
                               rtol=1e-5, atol=1e-5)

    # Multi-tile path: T > seq_tile with a partial last tile (tests the
    # global-position offset and masked write-back of the padded block).
    B2, C2, T2, dim2 = 2, 8, 320, 32
    x2 = jax.random.normal(k2, (B2, C2, T2), dtype=jnp.float32)
    out2 = jax.block_until_ready(
        fixed_positional_embedding(x2, dim2, seq_tile=128))
    ref2 = _reference(x2, dim2)
    assert out2.shape == (B2, C2 + dim2, T2)
    np.testing.assert_allclose(np.asarray(out2), np.asarray(ref2),
                               rtol=1e-5, atol=1e-4)

    print("KERNEL_OK")
</pallas_src>

<mosaic_0001>
module attributes {stable_mosaic.version = 11 : i64} {
  func.func @_posemb_concat_kernel(%arg0: i32, %arg1: i32, %arg2: memref<1x4x16xf32, #tpu.memory_space<vmem>>, %arg3: memref<4x1xf32, #tpu.memory_space<vmem>>, %arg4: memref<1x12x16xf32, #tpu.memory_space<vmem>>) attributes {dimension_semantics = [#tpu.dimension_semantics<parallel>, #tpu.dimension_semantics<parallel>], iteration_bounds = array<i64: 2, 1>, scalar_prefetch = 0 : i64, scratch_operands = 0 : i64, tpu.core_type = #tpu.core_type<tc>, window_params = [{transform_indices = @transform_0, window_bounds = array<i64: 1, 4, 16>}, {pipeline_mode = #tpu.pipeline_mode<synchronous>, transform_indices = @transform_1, window_bounds = array<i64: 4, 1>}, {transform_indices = @transform_2, window_bounds = array<i64: 1, 12, 16>}]} {
    %c16_i32 = arith.constant 16 : i32
    %0 = arith.muli %arg1, %c16_i32 : i32
    %1 = tpu.iota {dimensions = array<i32: 1>} : vector<1x16xi32>
    %2 = vector.broadcast %0 : i32 to vector<1x16xi32>
    %3 = arith.addi %2, %1 : vector<1x16xi32>
    %4 = arith.sitofp %3 : vector<1x16xi32> to vector<1x16xf32>
    %c0 = arith.constant 0 : index
    %c0_0 = arith.constant 0 : index
    %5 = vector.load %arg3[%c0, %c0_0] : memref<4x1xf32, #tpu.memory_space<vmem>>, vector<4x1xf32>
    %6 = vector.broadcast %5 : vector<4x1xf32> to vector<4x16xf32>
    %7 = vector.broadcast %4 : vector<1x16xf32> to vector<4x16xf32>
    %8 = arith.mulf %6, %7 : vector<4x16xf32>
    %c0_1 = arith.constant 0 : index
    %c0_2 = arith.constant 0 : index
    %c0_3 = arith.constant 0 : index
    %9 = vector.load %arg2[%c0_1, %c0_2, %c0_3] : memref<1x4x16xf32, #tpu.memory_space<vmem>>, vector<1x4x16xf32>
    %10 = vector.shape_cast %9 : vector<1x4x16xf32> to vector<4x16xf32>
    %11 = math.sin %8 : vector<4x16xf32>
    %12 = math.cos %8 : vector<4x16xf32>
    %13 = tpu.concatenate %10, %11, %12 in 0 : vector<4x16xf32>, vector<4x16xf32>, vector<4x16xf32> -> vector<12x16xf32>
    %c0_4 = arith.constant 0 : index
    %c0_5 = arith.constant 0 : index
    %c0_6 = arith.constant 0 : index
    %14 = vector.load %arg4[%c0_4, %c0_5, %c0_6] : memref<1x12x16xf32, #tpu.memory_space<vmem>>, vector<1x12x16xf32>
    %15 = vector.shape_cast %14 : vector<1x12x16xf32> to vector<12x16xf32>
    %16 = vector.shape_cast %13 : vector<12x16xf32> to vector<1x12x16xf32>
    tpu.vector_store %arg4[%c0_4, %c0_5, %c0_6], %16 {strides = array<i32>} : memref<1x12x16xf32, #tpu.memory_space<vmem>>, vector<1x12x16xf32>,
    return
  }
  func.func @transform_0(%arg0: i32, %arg1: i32) -> (i32, i32, i32) {
    %c0_i32 = arith.constant 0 : i32
    %c0_i32_0 = arith.constant 0 : i32
    return %arg0, %c0_i32, %arg1 : i32, i32, i32
  }
  func.func @transform_1(%arg0: i32, %arg1: i32) -> (i32, i32) {
    %c0_i32 = arith.constant 0 : i32
    %c0_i32_0 = arith.constant 0 : i32
    %c0_i32_1 = arith.constant 0 : i32
    return %c0_i32, %c0_i32_0 : i32, i32
  }
  func.func @transform_2(%arg0: i32, %arg1: i32) -> (i32, i32, i32) {
    %c0_i32 = arith.constant 0 : i32
    %c0_i32_0 = arith.constant 0 : i32
    return %arg0, %c0_i32, %arg1 : i32, i32, i32
  }
}

</mosaic_0001>

<bundles_post_ra>
// kernel: tpu_custom_call.1
= control target key start
LH: loop header
LB: loop body
LE: loop exit
PB: predicated region body
PF: predicated region fallthrough
CT: control target
= control target key end

     0   :  { %7 = vsyncpa [#allocation3], 0  ;;  %s856_s0 = inlined_call_operand.hbm [shape: f32[2,4,16], index: 0, kind: input, shape index: {}]   ;;  %s857_s1 = inlined_call_operand.vmem [shape: f32[4,1], index: 1, kind: input, shape index: {}]   ;;  %s858_s2 = inlined_call_operand.vmem [shape: f32[2,12,16], index: 2, kind: output, shape index: {}]  }
   0x1   :  { %9 = vsyncpa [#allocation3 + $0x1], 0  ;;  %s701_s9 = smov 0   ;;  %s703_s10 = smov 0  }
   0x2   :  { %s705_s11 = smov 0   ;;  %s707_s12 = smov 0  }
   0x3   :  { %s709_s13 = smov 0   ;;  %s711_s14 = smov 0  }
   0x4 LB: > { %s504_s15 = sadd.s32 4294967295, %s676_s14   ;;  %s27_s16 = sadd.s32 1, %s672_s13  ;;  %s676_s14 = sphi %s711_s14, %s15_s14   ;;  %s672_s13 = sphi %s709_s13, %s868_s13   ;;  %s668_s12 = sphi %s707_s12, %s867_s12   ;;  %s664_s11 = sphi %s705_s11, %s866_s11   ;;  %s660_s10 = sphi %s703_s10, %s865_s10   ;;  %s656_s9 = sphi %s701_s9, %s864_s9  }
   0x5   : > { %p29_p0 = scmp.ge.s32.totalorder %s27_s16, 2  ;;  %s36_s17 = sadd.s32 1, %s664_s11 }
   0x6   : > { %p43_p1 = scmp.ne.s32.totalorder %s664_s11, %s660_s10  ;;  %p44_p2 = scmp.eq.s32.totalorder %s676_s14, 0 }
   0x7   : > { %s870_s16 = smov (%p29_p0, %s27_s16), 0  ;;  %p49_p4 = scmp.ne.s32.totalorder %s660_s10, %s656_s9 }
   0x8   : > { %p737_p3 = por %p44_p2, %p43_p1  ;;  %s31_s19 = ssub.s32 %s672_s13, %s870_s16 }
   0x9   : > { %p50_p5 = scmp.eq.s32.totalorder %s504_s15, 0  ;;  %p34_p6 = scmp.eq.s32.totalorder %s31_s19, 0 }
   0xa   : > { %p535_p8 = scmp.lt.s32.totalorder %s676_s14, 2  ;;  %s125_s22 = sand.u32 1, %s664_s11  }
   0xb   : > { %p744_p7 = por %p50_p5, %p49_p4  ;;  %s509_s23 = sshll.u32 %s672_s13, 6 }
   0xc   : > { %s750_s21 = scalar_select %p34_p6, %s664_s11, %s36_s17  }
   0xd   : > { %s508_s24 = sshll.u32 %s125_s22, 2  ;;  %s757_s27 = scalar_lea.hbm %s856_s0, %s509_s23 }
   0xe   : > { %s129_s28 = scalar_lea.vmem [#allocation2], %s508_s24  ;;  %p761_p9 = pnand %p535_p8, %p737_p3 }
   0xf   : > { %s137_s29 = sshll.u32 %s129_s28, 4  ;;  %s126_s3 = scalar_lea.sflag [#allocation3], %s125_s22  ;;  %s765_s29 = int_to_ptr.vmem [resolvable:$true] %s137_s29 }
  0x10   : > { %s596_s4 = scalar_lea.hbm %s757_s27, 64  ;;  %p598_p13 = pneg %p761_p9 }
  0x11   : > { %p597_p12 = scmp.ne.s32.totalorder %s757_s27, %s596_s4  ;;  %s601_s7 = scalar_lea.hbm %s856_s0, 128 }
  0x12   : > { %p602_p2 = scmp.lt.u32.totalorder %s757_s27, %s856_s0  ;;  %p603_p3 = scmp.lt.u32.totalorder %s601_s7, %s596_s4 }
  0x13   : > { %p599_p0 = pnand %p598_p13, %p597_p12  ;;  %p605_p5 = scmp.lt.u32.totalorder %s596_s4, %s757_s27 }
  0x14   : > { %p604_p4 = por %p603_p3, %p602_p2 }
  0x15   : > { %p600_p1 = pneg %p599_p0 }
  0x16   : > { %p606_p6 = por %p605_p5, %p604_p4 }
  0x18   : > { %p607_p8 = pnand %p606_p6, %p600_p1 }
  0x1a   : > { %610 = shalt.err (!%p607_p8)
}
  0x1b   : > { %s611_s15 = scalar_lea.vmem %s765_s29, 64  ;;  %s678_s17 = smov [#allocation2]  }
  0x1c   : > { %p612_p12 = scmp.ne.s32.totalorder %s765_s29, %s611_s15  ;;  %s616_s18 = sshll.u32 %s678_s17, 4  ;;  %s617_s18 = int_to_ptr.vmem [resolvable:$false] %s616_s18 }
  0x1d   : > { %s618_s19 = scalar_lea.vmem %s617_s18, 128  ;;  %p619_p11 = scmp.lt.s32.totalorder %s765_s29, %s617_s18 }
  0x1e   : > { %p614_p0 = pnand %p612_p12, %p598_p13  ;;  %p620_p2 = scmp.lt.s32.totalorder %s618_s19, %s611_s15 }
  0x20   : > { %p615_p10 = pneg %p614_p0  ;;  %p621_p3 = por %p620_p2, %p619_p11 }
  0x22   : > { %p622_p4 = pnand %p621_p3, %p615_p10 }
  0x24   : > { %625 = shalt.err (!%p622_p4)
}
  0x25   : > { %534 = dma.hbm_to_vmem [thread:$0]  (!%p761_p9), %s757_s27, 64, %s765_s29, %s126_s3  }
  0x26   : > { %p862_p1 = scmp.lt.s32.totalorder %s676_s14, 3  ;;  %p863_p5 = scmp.ge.s32.totalorder %s676_s14, 1 }
  0x28   : > { %p143_p13 = pnand %p863_p5, %p862_p1 }
  0x29   : > { %s148_s22 = sand.u32 (!%p143_p13), 1, %s660_s10  }
  0x2a   : > { %146 = sbr.rel (%p143_p13) target bundleno = 265 (0x109), region = 28  ;;  %s799_s23 = sshll.u32 (!%p143_p13), %s148_s22, 2 }
  0x2b   : > { %s149_s24 = scalar_lea.sflag (!%p143_p13), [#allocation3], %s148_s22  ;;  %s152_s25 = scalar_lea.vmem (!%p143_p13), [#allocation2], %s799_s23 }
  0x31   : > { %651 = dma.done.wait (%p744_p7), %s149_s24, 64  }
  0x32   : > { %653 = vsyncadd (%p744_p7), %s149_s24, 4294967232  ;;  %v679_v0 = vmov 0   ;;  %v190_v1 = vld [vmem:[%s857_s1] sm:$0xf]  ;;  %v185_v2 = vlaneseq  ;;  %v680_v17 = vmov 683565275  }
  0x33   : > { %591 = vset.pattern.permute.xlu0 %v679_v0  ;;  %v681_v19 = vmov 2475754826   ;;  %v682_v22 = vmov 2131351028   ;;  %v683_v25 = vmov 2102212464  }
  0x34   : > { %193 = vperm.xlu0 %591, %v190_v1   ;;  %v186_v3 = vand.u32 127, %v185_v2  ;;  %v684_v28 = vmov 920167782   ;;  %v685_v31 = vmov 1326507024   ;;  %p176_p7 = scmp.lt.s32.totalorder %s668_s12, 1 }
  0x35   : > { %vm412_vm9 = vcmask 125952  }
  0x36   : > { %v189_v4 = vcvt.s32.f32 %v186_v3  ;;  %s872_s12 = smov (!%p176_p7, %s668_s12), 1 }
  0x37   : > { %s524_s20 = sshll.u32 %s872_s12, 4 }
  0x38   : > { %s183_s30 = scalar_lea.vmem %s858_s2, %s524_s20 }
  0xb3   : > { %v194_v5 = vpop.permute.xlu0 %193 }
  0xb4   : > { %v809_v6 = vmul.f32 %v194_v5, %v189_v4 }
  0xb6   : > { %v201_v7 = vand.u32 2139095040, %v809_v6  ;;  %v198_v11 = vand.u32 2147483647, %v809_v6  ;;  %vm200_vm7 = vcmp.lt.s32.totalorder %v809_v6, 0 }
  0xb8   : > { %v202_v8 = vshrl.u32 %v201_v7, 23  ;;  %v205_v14 = vand.u32 8388607, %v198_v11  ;;  %vm199_vm8 = vcmp.le.f32.partialorder %v198_v11, 0.7853982 }
  0xba   : > { %v514_v9 = vadd.s32 4294967169, %v202_v8  ;;  %v206_v33 = vor.u32 8388608, %v205_v14 }
  0xbc   : > { %v208_v10 = vadd.s32 1, %v514_v9  ;;  %v246_v47 = vshll.u32 %v206_v33, 8 }
  0xbe   : > { %vm209_vm0 = vcmp.gt.s32.totalorder %v208_v10, 0 }
  0xbf   : > { %v210_v12 = vsel %vm209_vm0, %v208_v10, 0  ;;  %vm290_vm0 = vweird.f32 %v809_v6 }
  0xc0   : > { %v212_v13 = vand.u32 31, %v210_v12  ;;  %v211_v16 = vshrl.u32 %v210_v12, 5 }
  0xc2   : > { %v213_v15 = vsub.s32 32, %v212_v13  ;;  %v215_v18 = vshll.u32 %v680_v17, %v212_v13  ;;  %v218_v20 = vshll.u32 %v681_v19, %v212_v13  ;;  %v221_v24 = vshll.u32 %v682_v22, %v212_v13 }
  0xc3   : > { %v224_v27 = vshll.u32 %v683_v25, %v212_v13  ;;  %v227_v30 = vshll.u32 %v684_v28, %v212_v13  ;;  %vm230_vm1 = vcmp.lt.s32.totalorder %v211_v16, 1  ;;  %vm233_vm2 = vcmp.lt.s32.totalorder %v211_v16, 4 }
  0xc4   : > { %v216_v21 = vshrl.u32 %v681_v19, %v213_v15  ;;  %v219_v23 = vshrl.u32 %v682_v22, %v213_v15  ;;  %v222_v26 = vshrl.u32 %v683_v25, %v213_v15  ;;  %v225_v29 = vshrl.u32 %v684_v28, %v213_v15 }
  0xc5   : > { %v228_v32 = vshrl.u32 %v685_v31, %v213_v15  ;;  %v214_v42 = vshrl.u32 %v680_v17, %v213_v15  ;;  %vm232_vm3 = vcmp.lt.s32.totalorder %v211_v16, 3  ;;  %vm231_vm4 = vcmp.lt.s32.totalorder %v211_v16, 2 }
  0xc6   : > { %v217_v34 = vor.u32 %v216_v21, %v215_v18  ;;  %v220_v35 = vor.u32 %v219_v23, %v218_v20  ;;  %v223_v36 = vor.u32 %v222_v26, %v221_v24  ;;  %v226_v37 = vor.u32 %v225_v29, %v224_v27 }
  0xc7   : > { %v229_v38 = vor.u32 %v228_v32, %v227_v30 }
  0xc8   : > { %v235_v39 = vsel %vm233_vm2, %v223_v36, 2102212464  ;;  %v238_v40 = vsel %vm230_vm1, %v217_v34, %v220_v35  ;;  %v242_v41 = vsel %vm230_vm1, %v220_v35, %v223_v36  ;;  %v239_v43 = vsel %vm233_vm2, %v226_v37, 920167782 }
  0xc9   : > { %v243_v44 = vsel %vm233_vm2, %v229_v38, 1326507024  ;;  %v240_v45 = vsel %vm232_vm3, %v223_v36, %v239_v43  ;;  %v234_v48 = vsel %vm230_vm1, %v214_v42, %v217_v34  ;;  %v236_v49 = vsel %vm232_vm3, %v220_v35, %v235_v39  ;;  %v197_v38 = vld [vmem:[%s152_s25] sm:$0xf] }
  0xca   : > { %v244_v46 = vsel %vm232_vm3, %v226_v37, %v243_v44  ;;  %v241_v50 = vsel %vm231_vm4, %v238_v40, %v240_v45  ;;  %v237_v56 = vsel %vm231_vm4, %v234_v48, %v236_v49  ;;  %vm408_vm1 = vcmask 1043456  }
  0xcb   : > { %v245_v51 = vsel %vm231_vm4, %v242_v41, %v244_v46  ;;  %v818_v54 = vmul.u32.u64.low %v246_v47, %v241_v50  ;;  %v819_v55 = vmul.u32.u64.high %v246_v47, %v241_v50, %v818_v54  ;;  %v253_v58 = vmul.u32 %v246_v47, %v237_v56 }
  0xcc   : > { %v815_v52 = vmul.u32.u64.low %v246_v47, %v245_v51  ;;  %v816_v53 = vmul.u32.u64.high %v246_v47, %v245_v51, %v815_v52  ;;  %vm410_vm2 = vcmask 130048  }
  0xcd   : > { %v256_v57 = vadd.s32 1, %v819_v55 }
  0xce   : > { %vm255_vm5 = vc.u32 %v816_v53, %v818_v54  ;;  %v254_v7 = vadd.s32 %v818_v54, %v816_v53 }
  0xcf   : > { %v257_v59 = vsel %vm255_vm5, %v256_v57, %v819_v55 }
  0xd0   : > { %v258_v60 = vadd.s32 %v257_v59, %v253_v58 }
  0xd2   : > { %v259_v61 = vadd.s32 536870912, %v258_v60 }
  0xd4   : > { %v260_v62 = vshrl.u32 %v259_v61, 30 }
  0xd6   : > { %v261_v63 = vshll.u32 %v260_v62, 30  ;;  %v284_v20 = vsub.s32 4, %v260_v62 }
  0xd8   : > { %v262_v0 = vsub.s32 %v258_v60, %v261_v63  ;;  %v285_v23 = vsel %vm200_vm7, %v284_v20, %v260_v62 }
  0xd9   : > { %v287_v25 = vsel %vm199_vm8, 0, %v285_v23 }
  0xda   : > { %v264_v1 = vsub.s32 0, %v262_v0  ;;  %v291_v26 = vadd.s32 3, %v287_v25  ;;  %v395_v28 = vand.u32 3, %v287_v25 }
  0xdc   : > { %v515_v2 = vmin.u32 %v264_v1, %v262_v0  ;;  %v292_v27 = vand.u32 3, %v291_v26  ;;  %vm400_vm11 = vcmp.eq.s32.totalorder %v395_v28, 2  ;;  %vm397_vm13 = vcmp.eq.s32.totalorder %v395_v28, 0 }
  0xdd   : > { %vm396_vm15 = vcmp.lt.s32.totalorder %v395_v28, 2 }
  0xde   : > { %v266_v3 = vclz %v515_v2  ;;  %vm297_vm10 = vcmp.eq.s32.totalorder %v292_v27, 2  ;;  %vm294_vm12 = vcmp.eq.s32.totalorder %v292_v27, 0  ;;  %vm293_vm14 = vcmp.lt.s32.totalorder %v292_v27, 2 }
  0xe0   : > { %v516_v4 = vadd.s32 4294967294, %v266_v3 }
  0xe2   : > { %vm517_vm6 = vcmp.lt.s32.totalorder %v516_v4, 0 }
  0xe3   : > { %v269_v5 = vsel %vm517_vm6, 0, %v516_v4 }
  0xe4   : > { %v270_v8 = vsub.s32 32, %v269_v5  ;;  %v274_v9 = vsub.s32 4294967266, %v269_v5  ;;  %v271_v10 = vshll.u32 %v262_v0, %v269_v5 }
  0xe6   : > { %v272_v12 = vshrl.u32 %v254_v7, %v270_v8  ;;  %v275_v13 = vadd.s32 127, %v274_v9 }
  0xe8   : > { %v273_v14 = vor.u32 %v272_v12, %v271_v10  ;;  %v276_v15 = vshll.u32 %v275_v13, 23 }
  0xea   : > { %v277_v16 = vor.u32 4788187, %v276_v15  ;;  %v280_v18 = vcvt.s32.f32 %v273_v14 }
  0xec   : > { %v278_v17 = vand.u32 2147483647, %v277_v16 }
  0xee   : > { %v281_v19 = vmul.f32 %v280_v18, %v278_v17 }
  0xf0   : > { %v282_v21 = vxor.u32 2147483648, %v281_v19 }
  0xf2   : > { %v283_v22 = vsel %vm200_vm7, %v282_v21, %v281_v19 }
  0xf3   : > { %v286_v24 = vsel %vm199_vm8, %v809_v6, %v283_v22 }
  0xf4   : > { %592 = vcosq.f32 %v286_v24 }
  0xf5   : > { %594 = vsinq.f32 %v286_v24 }
  0xfe   : > { %v593_v29 = vpop.eup %592 }
  0xff   : > { %v595_v30 = vpop.eup %594  ;;  %v298_v31 = vxor.u32 2147483648, %v593_v29 }
 0x100   : > { %v295_v32 = vxor.u32 2147483648, %v595_v30 }
 0x101   : > { %v299_v11 = vsel %vm297_vm10, %v298_v31, %v595_v30  ;;  %v402_v33 = vsel %vm400_vm11, %v298_v31, %v595_v30 }
 0x102   : > { %v296_v34 = vsel %vm294_vm12, %v593_v29, %v295_v32  ;;  %v399_v35 = vsel %vm397_vm13, %v593_v29, %v295_v32 }
 0x103   : > { %v300_v36 = vsel %vm293_vm14, %v296_v34, %v299_v11  ;;  %v403_v37 = vsel %vm396_vm15, %v399_v35, %v402_v33 }
 0x104   : > { %v301_v39 = vsel %vm290_vm0, nan, %v300_v36  ;;  %v404_v40 = vsel %vm290_vm0, nan, %v403_v37 }
 0x105   : > { %v406_v41 = vrot.slane %v301_v39, 4  ;;  %413 = vst.msk [vmem:[%s183_s30 + $0x8] sm:$0xf] %vm412_vm9, %v404_v40 }
 0x107   : > { %v409_v42 = vsel %vm408_vm1, %v197_v38, %v406_v41 }
 0x108   : > { %411 = vst.msk [vmem:[%s183_s30] sm:$0xff] %vm410_vm2, %v409_v42 }
 0x109 PF: > { %s15_s14 = sadd.s32 1, %s676_s14   ;;  %s864_s9 = smov %s660_s10 }
 0x10a   : > { %p12_p9 = scmp.ge.s32.totalorder %s15_s14, 4   ;;  %s865_s10 = smov %s664_s11 }
 0x10b   : > { %s866_s11 = smov %s750_s21  ;;  %s867_s12 = smov %s672_s13 }
 0x10c   : > { %s868_s13 = smov %s870_s16  ;;  %14 = sbr.rel (!%p12_p9) target bundleno = 4 (0x4), region = 68 }
 0x113   :  { %441 = vsyncpa [#allocation3], 1 }
 0x114   :  { %443 = vsyncpa [#allocation3 + $0x1], 1 }

</bundles_post_ra>
